<compile_context>
chip_gen: v7x
topology: tpu7x:2x2x1
jax: 0.10.0
libtpu: 0.0.40
codegen_flags: <defaults>
</compile_context>

<pallas_src>
import jax
import jax.numpy as jnp
from jax.experimental import pallas as pl
from jax.experimental.pallas import tpu as pltpu


def _net_kernel(x_ref, w_ref, y_ref):
    # Single fused linear: y = x @ (W1^T @ W2^T), f32 accumulation on the MXU.
    # The first-layer intermediate never materializes (folded into w_ref).
    y_ref[...] = jnp.dot(
        x_ref[...], w_ref[...], preferred_element_type=jnp.float32
    ).astype(y_ref.dtype)


def net_forward(x, w1, w2, *, tile_b=512, compute_dtype=None):
    """Forward pass of Net.

    x : (B, idim)           activations
    w1: (vector_dim, idim)  l1.weight (PyTorch layout)
    w2: (odim, vector_dim)  l2.weight (PyTorch layout)
    compute_dtype: optional (e.g. jnp.bfloat16) to halve streamed input bytes;
                   accumulation stays f32 and the output is f32.
    """
    B, idim = x.shape
    vector_dim = w1.shape[0]
    odim = w2.shape[0]

    # Fold the two bias-free linears once (tiny (idim x odim) matrix, done in f32):
    #   y = x @ W1^T @ W2^T = x @ (W1^T @ W2^T)
    w = jnp.dot(w1.T, w2.T, preferred_element_type=jnp.float32)  # (idim, odim)

    if compute_dtype is not None:
        x = x.astype(compute_dtype)
        w = w.astype(compute_dtype)

    # Large batch tile: mem-bound kernel, so the biggest tile that fits VMEM wins.
    # (512, idim) f32 double-buffered is ~128 KiB — trivially fits v5e/v6e/v7x VMEM.
    tile_b = min(tile_b, B)
    grid = (pl.cdiv(B, tile_b),)

    cost = pl.CostEstimate(
        flops=2 * B * idim * odim,
        transcendentals=0,
        bytes_accessed=(x.size * x.dtype.itemsize
                        + w.size * w.dtype.itemsize
                        + B * odim * 4),
    )

    return pl.pallas_call(
        _net_kernel,
        out_shape=jax.ShapeDtypeStruct((B, odim), jnp.float32),
        grid_spec=pl.GridSpec(
            grid=grid,
            in_specs=[
                # x streamed over batch tiles (batch on sublanes, features on lanes)
                pl.BlockSpec((tile_b, idim), lambda i: (i, 0)),
                # folded weight: constant block index -> fetched once, stays resident
                pl.BlockSpec((idim, odim), lambda i: (0, 0)),
            ],
            out_specs=pl.BlockSpec((tile_b, odim), lambda i: (i, 0)),
        ),
        compiler_params=pltpu.CompilerParams(
            dimension_semantics=("parallel",),  # batch tiles are independent (v7x 2 TCs)
        ),
        cost_estimate=cost,
    )(x, w)


if __name__ == "__main__":
    # Shapes consistent with the module: idim=32, vector_dim=16, odim=8.
    # Batch large enough to exercise the tiled grid (2 tiles of 512 rows).
    B, idim, vector_dim, odim = 1024, 32, 16, 8

    key = jax.random.PRNGKey(0)
    kx, k1, k2 = jax.random.split(key, 3)

    x = jax.random.normal(kx, (B, idim), dtype=jnp.float32)
    # Deterministic parameter init (synthetic; mimics nn.Linear weight shapes)
    w1 = jax.random.normal(k1, (vector_dim, idim), dtype=jnp.float32) * 0.1
    w2 = jax.random.normal(k2, (odim, vector_dim), dtype=jnp.float32) * 0.1

    # f32 path (exact vs. reference up to matmul re-association)
    y = jax.block_until_ready(net_forward(x, w1, w2))

    # Reference in plain JAX (same math as the PyTorch forward)
    y_ref = (x @ w1.T) @ w2.T
    assert y.shape == (B, odim)
    assert jnp.allclose(y, y_ref, atol=1e-5, rtol=1e-5)

    # bf16-input path (halves streamed bytes on v6e/v7x), f32 accumulate/output.
    y_bf16 = jax.block_until_ready(net_forward(x, w1, w2, compute_dtype=jnp.bfloat16))
    assert y_bf16.shape == (B, odim)
    assert jnp.allclose(y_bf16, y_ref, atol=5e-2, rtol=5e-2)

    print("KERNEL_OK")
</pallas_src>

<mosaic_0001>
module attributes {stable_mosaic.version = 11 : i64} {
  func.func @_net_kernel(%arg0: i32, %arg1: memref<512x32xf32, #tpu.memory_space<vmem>>, %arg2: memref<32x8xf32, #tpu.memory_space<vmem>>, %arg3: memref<512x8xf32, #tpu.memory_space<vmem>>) attributes {dimension_semantics = [#tpu.dimension_semantics<parallel>], iteration_bounds = array<i64: 2>, scalar_prefetch = 0 : i64, scratch_operands = 0 : i64, tpu.core_type = #tpu.core_type<tc>, window_params = [{transform_indices = @transform_0, window_bounds = array<i64: 512, 32>}, {pipeline_mode = #tpu.pipeline_mode<synchronous>, transform_indices = @transform_1, window_bounds = array<i64: 32, 8>}, {transform_indices = @transform_2, window_bounds = array<i64: 512, 8>}]} {
    %c0 = arith.constant 0 : index
    %c0_0 = arith.constant 0 : index
    %0 = vector.load %arg1[%c0, %c0_0] : memref<512x32xf32, #tpu.memory_space<vmem>>, vector<512x32xf32>
    %c0_1 = arith.constant 0 : index
    %c0_2 = arith.constant 0 : index
    %1 = vector.load %arg2[%c0_1, %c0_2] : memref<32x8xf32, #tpu.memory_space<vmem>>, vector<32x8xf32>
    %cst = arith.constant dense<0.000000e+00> : vector<512x8xf32>
    %2 = tpu.matmul %0, %1, %cst {dimension_numbers = #tpu.dot_dimension_numbers<[1], [0], [0], [1], [0, 0, 1, 1], [], []>} : vector<512x32xf32>, vector<32x8xf32>, vector<512x8xf32> -> vector<512x8xf32>
    %c0_3 = arith.constant 0 : index
    %c0_4 = arith.constant 0 : index
    %3 = vector.load %arg3[%c0_3, %c0_4] : memref<512x8xf32, #tpu.memory_space<vmem>>, vector<512x8xf32>
    tpu.vector_store %arg3[%c0_3, %c0_4], %2 {strides = array<i32>} : memref<512x8xf32, #tpu.memory_space<vmem>>, vector<512x8xf32>,
    return
  }
  func.func @transform_0(%arg0: i32) -> (i32, i32) {
    %c0_i32 = arith.constant 0 : i32
    %c0_i32_0 = arith.constant 0 : i32
    return %arg0, %c0_i32 : i32, i32
  }
  func.func @transform_1(%arg0: i32) -> (i32, i32) {
    %c0_i32 = arith.constant 0 : i32
    %c0_i32_0 = arith.constant 0 : i32
    %c0_i32_1 = arith.constant 0 : i32
    return %c0_i32, %c0_i32_0 : i32, i32
  }
  func.func @transform_2(%arg0: i32) -> (i32, i32) {
    %c0_i32 = arith.constant 0 : i32
    %c0_i32_0 = arith.constant 0 : i32
    return %arg0, %c0_i32 : i32, i32
  }
}

</mosaic_0001>

<bundles_post_ra>
// kernel: tpu_custom_call.1
= control target key start
LH: loop header
LB: loop body
LE: loop exit
PB: predicated region body
PF: predicated region fallthrough
CT: control target
= control target key end

     0   :  { %s1204_s9 = smov 0   ;;  %s1500_s0 = inlined_call_operand.vmem [shape: f32[1024,32], index: 0, kind: input, shape index: {}]   ;;  %s1501_s1 = inlined_call_operand.vmem [shape: f32[32,8], index: 1, kind: input, shape index: {}]   ;;  %s1502_s2 = inlined_call_operand.vmem [shape: f32[1024,8], index: 2, kind: output, shape index: {}]  }
   0x1 LB: > { %s914_s10 = sadd.s32 4294967295, %s1187_s9   ;;  %p918_p0 = scmp.ge.s32.totalorder %s1187_s9, 1  ;;  %s1187_s9 = sphi %s1204_s9, %s12_s9  }
   0x2   : > { %p113_p1 = scmp.lt.s32.totalorder %s1187_s9, 3 }
   0x4   : > { %p114_p2 = pnand %p918_p0, %p113_p1 }
   0x5   : > { %v211_v0 = vld [vmem:[%s1501_s1] sm:$0xff] (!%p114_p2)  ;;  %v212_v1 = vld [vmem:[%s1501_s1 + $0x8] sm:$0xff] (!%p114_p2)  ;;  %v213_v2 = vld [vmem:[%s1501_s1 + $0x10] sm:$0xff] (!%p114_p2)  ;;  %s919_s17 = sshll.u32 (!%p114_p2), %s914_s10, 6  ;;  %vm215_vm0 = vcmask (!%p114_p2), 261120   ;;  %vm793_vm1 = vcmask (!%p114_p2), 64512  }
   0x6   : > { %117 = sbr.rel (%p114_p2) target bundleno = 293 (0x125), region = 28  ;;  %v1161_v3 = vpack.c.bf16 (!%p114_p2), %v212_v1, %v211_v0  ;;  %v214_v4 = vld [vmem:[%s1501_s1 + $0x18] sm:$0xff] (!%p114_p2)  ;;  %p136_p3 = scmp.lt.s32.totalorder (!%p114_p2), %s919_s17, 127 }
   0x7   : > { %v1165_v5 = vpack.c.bf16 (!%p114_p2), %v214_v4, %v213_v2 }
   0x8   : > { %1162 = vmatprep.subr.bf16.mxu0 (!%p114_p2), %v1161_v3  ;;  %1169 = vmatprep.subr.bf16.mxu1 (!%p114_p2), %v1161_v3 }
   0x9   : > { %1164 = vmatpush3.bf16.msra.mxu0 (!%p114_p2), %v1161_v3  ;;  %1171 = vmatpush3.bf16.msra.mxu1 (!%p114_p2), %v1161_v3 }
   0xa   : > { %1166 = vmatprep.subr.bf16.mxu0 (!%p114_p2), %v1165_v5  ;;  %1170 = vmatprep.subr.bf16.mxu1 (!%p114_p2), %v1165_v5 }
   0xd   : > { %s1504_s17 = smov (!%p136_p3, %s919_s17), 127  ;;  %1168 = vmatpush3.bf16.msra.mxu0 %v1165_v5  ;;  %1172 = vmatpush3.bf16.msra.mxu1 %v1165_v5 }
   0xe   : > { %s920_s20 = sshll.u32 %s1504_s17, 3 }
   0xf   : > { %s1232_s23 = scalar_lea.vmem %s1500_s0, %s920_s20  ;;  %s1367_s26 = scalar_lea.vmem %s1502_s2, %s920_s20 }
  0x10   : > { %v147_v6 = vld [vmem:[%s1232_s23] sm:$0xff]  ;;  %v148_v8 = vld [vmem:[%s1232_s23 + $0x8] sm:$0xff]  ;;  %v149_v10 = vld [vmem:[%s1232_s23 + $0x10] sm:$0xff] }
  0x11   : > { %v179_v7 = vld [vmem:[%s1232_s23 + $0x100] sm:$0xff]  ;;  %v180_v9 = vld [vmem:[%s1232_s23 + $0x108] sm:$0xff]  ;;  %1065 = vmatprep.mubr.msk.f32.mxu0 %vm215_vm0, %v147_v6  ;;  %v181_v11 = vld [vmem:[%s1232_s23 + $0x110] sm:$0xff] }
  0x12   : > { %1113 = vmatprep.mubr.msk.f32.mxu1 %vm215_vm0, %v179_v7  ;;  %1066 = vmatmul.mubr.msk.f32.vlgmr.msra.gmra.mrb[0].mxu0 %vm215_vm0, %v148_v8  ;;  %v150_v12 = vld [vmem:[%s1232_s23 + $0x18] sm:$0xff]  ;;  %v151_v14 = vld [vmem:[%s1232_s23 + $0x20] sm:$0xff]  ;;  %v152_v16 = vld [vmem:[%s1232_s23 + $0x28] sm:$0xff] }
  0x13   : > { %1114 = vmatmul.mubr.msk.f32.vlgmr.msra.gmra.mrb[0].mxu1 %vm215_vm0, %v180_v9  ;;  %1068 = vmatprep.mubr.msk.f32.mxu0 %vm215_vm0, %v149_v10  ;;  %v182_v13 = vld [vmem:[%s1232_s23 + $0x118] sm:$0xff]  ;;  %v183_v15 = vld [vmem:[%s1232_s23 + $0x120] sm:$0xff]  ;;  %v184_v17 = vld [vmem:[%s1232_s23 + $0x128] sm:$0xff] }
  0x14   : > { %1116 = vmatprep.mubr.msk.f32.mxu1 %vm215_vm0, %v181_v11  ;;  %v153_v18 = vld [vmem:[%s1232_s23 + $0x30] sm:$0xff]  ;;  %v154_v20 = vld [vmem:[%s1232_s23 + $0x38] sm:$0xff]  ;;  %v155_v22 = vld [vmem:[%s1232_s23 + $0x40] sm:$0xff] }
  0x15   : > { %v185_v19 = vld [vmem:[%s1232_s23 + $0x130] sm:$0xff]  ;;  %v186_v21 = vld [vmem:[%s1232_s23 + $0x138] sm:$0xff]  ;;  %v187_v23 = vld [vmem:[%s1232_s23 + $0x140] sm:$0xff] }
  0x16   : > { %1069 = vmatmul.mubr.msk.f32.gmra.mrb[2].mxu0 %vm215_vm0, %v150_v12  ;;  %v156_v24 = vld [vmem:[%s1232_s23 + $0x48] sm:$0xff]  ;;  %v157_v26 = vld [vmem:[%s1232_s23 + $0x50] sm:$0xff]  ;;  %v158_v28 = vld [vmem:[%s1232_s23 + $0x58] sm:$0xff] }
  0x17   : > { %1117 = vmatmul.mubr.msk.f32.gmra.mrb[2].mxu1 %vm215_vm0, %v182_v13  ;;  %1071 = vmatprep.mubr.msk.f32.mxu0 %vm215_vm0, %v151_v14  ;;  %v188_v25 = vld [vmem:[%s1232_s23 + $0x148] sm:$0xff]  ;;  %v189_v27 = vld [vmem:[%s1232_s23 + $0x150] sm:$0xff]  ;;  %v190_v29 = vld [vmem:[%s1232_s23 + $0x158] sm:$0xff] }
  0x18   : > { %1119 = vmatprep.mubr.msk.f32.mxu1 %vm215_vm0, %v183_v15  ;;  %v159_v30 = vld [vmem:[%s1232_s23 + $0x60] sm:$0xff]  ;;  %v160_v32 = vld [vmem:[%s1232_s23 + $0x68] sm:$0xff]  ;;  %v161_v34 = vld [vmem:[%s1232_s23 + $0x70] sm:$0xff] }
  0x19   : > { %v191_v31 = vld [vmem:[%s1232_s23 + $0x160] sm:$0xff]  ;;  %v192_v33 = vld [vmem:[%s1232_s23 + $0x168] sm:$0xff]  ;;  %v193_v35 = vld [vmem:[%s1232_s23 + $0x170] sm:$0xff] }
  0x1a   : > { %1072 = vmatmul.mubr.msk.f32.gmra.mrb[4].mxu0 %vm215_vm0, %v152_v16  ;;  %v162_v36 = vld [vmem:[%s1232_s23 + $0x78] sm:$0xff]  ;;  %v163_v38 = vld [vmem:[%s1232_s23 + $0x80] sm:$0xff]  ;;  %v164_v40 = vld [vmem:[%s1232_s23 + $0x88] sm:$0xff] }
  0x1b   : > { %1120 = vmatmul.mubr.msk.f32.gmra.mrb[4].mxu1 %vm215_vm0, %v184_v17  ;;  %1074 = vmatprep.mubr.msk.f32.mxu0 %vm215_vm0, %v153_v18  ;;  %v194_v37 = vld [vmem:[%s1232_s23 + $0x178] sm:$0xff]  ;;  %v195_v39 = vld [vmem:[%s1232_s23 + $0x180] sm:$0xff]  ;;  %v196_v41 = vld [vmem:[%s1232_s23 + $0x188] sm:$0xff] }
  0x1c   : > { %1122 = vmatprep.mubr.msk.f32.mxu1 %vm215_vm0, %v185_v19  ;;  %v165_v42 = vld [vmem:[%s1232_s23 + $0x90] sm:$0xff]  ;;  %v166_v44 = vld [vmem:[%s1232_s23 + $0x98] sm:$0xff]  ;;  %v167_v46 = vld [vmem:[%s1232_s23 + $0xa0] sm:$0xff] }
  0x1d   : > { %v197_v43 = vld [vmem:[%s1232_s23 + $0x190] sm:$0xff]  ;;  %v198_v45 = vld [vmem:[%s1232_s23 + $0x198] sm:$0xff]  ;;  %v199_v47 = vld [vmem:[%s1232_s23 + $0x1a0] sm:$0xff] }
  0x1e   : > { %1075 = vmatmul.mubr.msk.f32.gmra.mrb[6].mxu0 %vm215_vm0, %v154_v20  ;;  %v168_v48 = vld [vmem:[%s1232_s23 + $0xa8] sm:$0xff]  ;;  %v169_v50 = vld [vmem:[%s1232_s23 + $0xb0] sm:$0xff]  ;;  %v170_v52 = vld [vmem:[%s1232_s23 + $0xb8] sm:$0xff] }
  0x1f   : > { %1123 = vmatmul.mubr.msk.f32.gmra.mrb[6].mxu1 %vm215_vm0, %v186_v21  ;;  %1077 = vmatprep.mubr.msk.f32.mxu0 %vm215_vm0, %v155_v22  ;;  %v200_v49 = vld [vmem:[%s1232_s23 + $0x1a8] sm:$0xff]  ;;  %v201_v51 = vld [vmem:[%s1232_s23 + $0x1b0] sm:$0xff]  ;;  %v202_v53 = vld [vmem:[%s1232_s23 + $0x1b8] sm:$0xff] }
  0x20   : > { %1125 = vmatprep.mubr.msk.f32.mxu1 %vm215_vm0, %v187_v23  ;;  %v171_v54 = vld [vmem:[%s1232_s23 + $0xc0] sm:$0xff]  ;;  %v172_v56 = vld [vmem:[%s1232_s23 + $0xc8] sm:$0xff]  ;;  %v173_v58 = vld [vmem:[%s1232_s23 + $0xd0] sm:$0xff] }
  0x21   : > { %v203_v55 = vld [vmem:[%s1232_s23 + $0x1c0] sm:$0xff]  ;;  %v204_v57 = vld [vmem:[%s1232_s23 + $0x1c8] sm:$0xff]  ;;  %v205_v59 = vld [vmem:[%s1232_s23 + $0x1d0] sm:$0xff] }
  0x22   : > { %1078 = vmatmul.mubr.msk.f32.gmra.mrb[8].mxu0 %vm215_vm0, %v156_v24  ;;  %v174_v60 = vld [vmem:[%s1232_s23 + $0xd8] sm:$0xff]  ;;  %v175_v62 = vld [vmem:[%s1232_s23 + $0xe0] sm:$0xff]  ;;  %v176_v0 = vld [vmem:[%s1232_s23 + $0xe8] sm:$0xff] }
  0x23   : > { %1126 = vmatmul.mubr.msk.f32.gmra.mrb[8].mxu1 %vm215_vm0, %v188_v25  ;;  %1080 = vmatprep.mubr.msk.f32.mxu0 %vm215_vm0, %v157_v26  ;;  %v206_v61 = vld [vmem:[%s1232_s23 + $0x1d8] sm:$0xff]  ;;  %v207_v63 = vld [vmem:[%s1232_s23 + $0x1e0] sm:$0xff]  ;;  %v208_v1 = vld [vmem:[%s1232_s23 + $0x1e8] sm:$0xff] }
  0x24   : > { %1128 = vmatprep.mubr.msk.f32.mxu1 %vm215_vm0, %v189_v27  ;;  %v177_v2 = vld [vmem:[%s1232_s23 + $0xf0] sm:$0xff]  ;;  %v178_v4 = vld [vmem:[%s1232_s23 + $0xf8] sm:$0xff] }
  0x25   : > { %v209_v3 = vld [vmem:[%s1232_s23 + $0x1f0] sm:$0xff]  ;;  %v210_v5 = vld [vmem:[%s1232_s23 + $0x1f8] sm:$0xff] }
  0x26   : > { %1081 = vmatmul.mubr.msk.f32.gmra.mrb[10].mxu0 %vm215_vm0, %v158_v28 }
  0x27   : > { %1129 = vmatmul.mubr.msk.f32.gmra.mrb[10].mxu1 %vm215_vm0, %v190_v29  ;;  %1083 = vmatprep.mubr.msk.f32.mxu0 %vm215_vm0, %v159_v30 }
  0x28   : > { %1131 = vmatprep.mubr.msk.f32.mxu1 %vm215_vm0, %v191_v31 }
  0x2a   : > { %1084 = vmatmul.mubr.msk.f32.gmra.mrb[12].mxu0 %vm215_vm0, %v160_v32 }
  0x2b   : > { %1132 = vmatmul.mubr.msk.f32.gmra.mrb[12].mxu1 %vm215_vm0, %v192_v33  ;;  %1086 = vmatprep.mubr.msk.f32.mxu0 %vm215_vm0, %v161_v34 }
  0x2c   : > { %1134 = vmatprep.mubr.msk.f32.mxu1 %vm215_vm0, %v193_v35 }
  0x2e   : > { %1087 = vmatmul.mubr.msk.f32.gmra.mrb[14].mxu0 %vm215_vm0, %v162_v36 }
  0x2f   : > { %1135 = vmatmul.mubr.msk.f32.gmra.mrb[14].mxu1 %vm215_vm0, %v194_v37  ;;  %1089 = vmatprep.mubr.msk.f32.mxu0 %vm215_vm0, %v163_v38 }
  0x30   : > { %1137 = vmatprep.mubr.msk.f32.mxu1 %vm215_vm0, %v195_v39 }
  0x32   : > { %1090 = vmatmul.mubr.msk.f32.gmra.mrb[16].mxu0 %vm215_vm0, %v164_v40 }
  0x33   : > { %1138 = vmatmul.mubr.msk.f32.gmra.mrb[16].mxu1 %vm215_vm0, %v196_v41  ;;  %1092 = vmatprep.mubr.msk.f32.mxu0 %vm215_vm0, %v165_v42 }
  0x34   : > { %1140 = vmatprep.mubr.msk.f32.mxu1 %vm215_vm0, %v197_v43 }
  0x36   : > { %1093 = vmatmul.mubr.msk.f32.gmra.mrb[18].mxu0 %vm215_vm0, %v166_v44 }
  0x37   : > { %1141 = vmatmul.mubr.msk.f32.gmra.mrb[18].mxu1 %vm215_vm0, %v198_v45  ;;  %1095 = vmatprep.mubr.msk.f32.mxu0 %vm215_vm0, %v167_v46 }
  0x38   : > { %1143 = vmatprep.mubr.msk.f32.mxu1 %vm215_vm0, %v199_v47 }
  0x3a   : > { %1096 = vmatmul.mubr.msk.f32.gmra.mrb[20].mxu0 %vm215_vm0, %v168_v48 }
  0x3b   : > { %1144 = vmatmul.mubr.msk.f32.gmra.mrb[20].mxu1 %vm215_vm0, %v200_v49  ;;  %1098 = vmatprep.mubr.msk.f32.mxu0 %vm215_vm0, %v169_v50 }
  0x3c   : > { %1146 = vmatprep.mubr.msk.f32.mxu1 %vm215_vm0, %v201_v51 }
  0x3e   : > { %1099 = vmatmul.mubr.msk.f32.gmra.mrb[22].mxu0 %vm215_vm0, %v170_v52 }
  0x3f   : > { %1147 = vmatmul.mubr.msk.f32.gmra.mrb[22].mxu1 %vm215_vm0, %v202_v53  ;;  %1101 = vmatprep.mubr.msk.f32.mxu0 %vm215_vm0, %v171_v54 }
  0x40   : > { %1149 = vmatprep.mubr.msk.f32.mxu1 %vm215_vm0, %v203_v55 }
  0x42   : > { %1102 = vmatmul.mubr.msk.f32.gmra.mrb[24].mxu0 %vm215_vm0, %v172_v56 }
  0x43   : > { %1150 = vmatmul.mubr.msk.f32.gmra.mrb[24].mxu1 %vm215_vm0, %v204_v57  ;;  %1104 = vmatprep.mubr.msk.f32.mxu0 %vm215_vm0, %v173_v58 }
  0x44   : > { %1152 = vmatprep.mubr.msk.f32.mxu1 %vm215_vm0, %v205_v59 }
  0x46   : > { %1105 = vmatmul.mubr.msk.f32.gmra.mrb[26].mxu0 %vm215_vm0, %v174_v60 }
  0x47   : > { %1153 = vmatmul.mubr.msk.f32.gmra.mrb[26].mxu1 %vm215_vm0, %v206_v61  ;;  %1107 = vmatprep.mubr.msk.f32.mxu0 %vm215_vm0, %v175_v62 }
  0x48   : > { %1155 = vmatprep.mubr.msk.f32.mxu1 %vm215_vm0, %v207_v63 }
  0x4a   : > { %1108 = vmatmul.mubr.msk.f32.gmra.mrb[28].mxu0 %vm215_vm0, %v176_v0 }
  0x4b   : > { %1156 = vmatmul.mubr.msk.f32.gmra.mrb[28].mxu1 %vm215_vm0, %v208_v1  ;;  %1110 = vmatprep.mubr.msk.f32.mxu0 %vm215_vm0, %v177_v2 }
  0x4c   : > { %1158 = vmatprep.mubr.msk.f32.mxu1 %vm215_vm0, %v209_v3 }
  0x4e   : > { %1111 = vmatmul.mubr.msk.f32.gmra.mrb[30].mxu0 %vm215_vm0, %v178_v4 }
  0x4f   : > { %1159 = vmatmul.mubr.msk.f32.gmra.mrb[30].mxu1 %vm215_vm0, %v210_v5 }
  0xe5   : > { %v1067_v6 = vpop.f32.mrb[0].mxu0 }
  0xe6   : > { %v1115_v7 = vpop.f32.mrb[0].mxu1  ;;  %795 = vst.msk [vmem:[%s1367_s26 + $0x8] sm:$0xff] %vm793_vm1, %v1067_v6  ;;  %v474_v8 = vpop.f32.mrb[1].mxu0 }
  0xe7   : > { %827 = vst.msk [vmem:[%s1367_s26 + $0x108] sm:$0xff] %vm793_vm1, %v1115_v7  ;;  %v634_v9 = vpop.f32.mrb[1].mxu1  ;;  %794 = vst.msk [vmem:[%s1367_s26] sm:$0xff] %vm793_vm1, %v474_v8 }
  0xe8   : > { %826 = vst.msk [vmem:[%s1367_s26 + $0x100] sm:$0xff] %vm793_vm1, %v634_v9 }
  0xe9   : > { %v1070_v10 = vpop.f32.mrb[2].mxu0 }
  0xea   : > { %v1118_v11 = vpop.f32.mrb[2].mxu1  ;;  %797 = vst.msk [vmem:[%s1367_s26 + $0x18] sm:$0xff] %vm793_vm1, %v1070_v10  ;;  %v484_v12 = vpop.f32.mrb[3].mxu0 }
  0xeb   : > { %829 = vst.msk [vmem:[%s1367_s26 + $0x118] sm:$0xff] %vm793_vm1, %v1118_v11  ;;  %v644_v13 = vpop.f32.mrb[3].mxu1  ;;  %796 = vst.msk [vmem:[%s1367_s26 + $0x10] sm:$0xff] %vm793_vm1, %v484_v12 }
  0xec   : > { %828 = vst.msk [vmem:[%s1367_s26 + $0x110] sm:$0xff] %vm793_vm1, %v644_v13 }
  0xed   : > { %v1073_v14 = vpop.f32.mrb[4].mxu0 }
  0xee   : > { %v1121_v15 = vpop.f32.mrb[4].mxu1  ;;  %799 = vst.msk [vmem:[%s1367_s26 + $0x28] sm:$0xff] %vm793_vm1, %v1073_v14  ;;  %v494_v16 = vpop.f32.mrb[5].mxu0 }
  0xef   : > { %831 = vst.msk [vmem:[%s1367_s26 + $0x128] sm:$0xff] %vm793_vm1, %v1121_v15  ;;  %v654_v17 = vpop.f32.mrb[5].mxu1  ;;  %798 = vst.msk [vmem:[%s1367_s26 + $0x20] sm:$0xff] %vm793_vm1, %v494_v16 }
  0xf0   : > { %830 = vst.msk [vmem:[%s1367_s26 + $0x120] sm:$0xff] %vm793_vm1, %v654_v17 }
  0xf1   : > { %v1076_v18 = vpop.f32.mrb[6].mxu0 }
  0xf2   : > { %v1124_v19 = vpop.f32.mrb[6].mxu1  ;;  %801 = vst.msk [vmem:[%s1367_s26 + $0x38] sm:$0xff] %vm793_vm1, %v1076_v18  ;;  %v504_v20 = vpop.f32.mrb[7].mxu0 }
  0xf3   : > { %833 = vst.msk [vmem:[%s1367_s26 + $0x138] sm:$0xff] %vm793_vm1, %v1124_v19  ;;  %v664_v21 = vpop.f32.mrb[7].mxu1  ;;  %800 = vst.msk [vmem:[%s1367_s26 + $0x30] sm:$0xff] %vm793_vm1, %v504_v20 }
  0xf4   : > { %832 = vst.msk [vmem:[%s1367_s26 + $0x130] sm:$0xff] %vm793_vm1, %v664_v21 }
  0xf5   : > { %v1079_v22 = vpop.f32.mrb[8].mxu0 }
  0xf6   : > { %v1127_v23 = vpop.f32.mrb[8].mxu1  ;;  %803 = vst.msk [vmem:[%s1367_s26 + $0x48] sm:$0xff] %vm793_vm1, %v1079_v22  ;;  %v514_v24 = vpop.f32.mrb[9].mxu0 }
  0xf7   : > { %835 = vst.msk [vmem:[%s1367_s26 + $0x148] sm:$0xff] %vm793_vm1, %v1127_v23  ;;  %v674_v25 = vpop.f32.mrb[9].mxu1  ;;  %802 = vst.msk [vmem:[%s1367_s26 + $0x40] sm:$0xff] %vm793_vm1, %v514_v24 }
  0xf8   : > { %834 = vst.msk [vmem:[%s1367_s26 + $0x140] sm:$0xff] %vm793_vm1, %v674_v25 }
  0xf9   : > { %v1082_v26 = vpop.f32.mrb[10].mxu0 }
  0xfa   : > { %v1130_v27 = vpop.f32.mrb[10].mxu1  ;;  %805 = vst.msk [vmem:[%s1367_s26 + $0x58] sm:$0xff] %vm793_vm1, %v1082_v26  ;;  %v524_v28 = vpop.f32.mrb[11].mxu0 }
  0xfb   : > { %837 = vst.msk [vmem:[%s1367_s26 + $0x158] sm:$0xff] %vm793_vm1, %v1130_v27  ;;  %v684_v29 = vpop.f32.mrb[11].mxu1  ;;  %804 = vst.msk [vmem:[%s1367_s26 + $0x50] sm:$0xff] %vm793_vm1, %v524_v28 }
  0xfc   : > { %836 = vst.msk [vmem:[%s1367_s26 + $0x150] sm:$0xff] %vm793_vm1, %v684_v29 }
  0xfd   : > { %v1085_v30 = vpop.f32.mrb[12].mxu0 }
  0xfe   : > { %v1133_v31 = vpop.f32.mrb[12].mxu1  ;;  %807 = vst.msk [vmem:[%s1367_s26 + $0x68] sm:$0xff] %vm793_vm1, %v1085_v30  ;;  %v534_v32 = vpop.f32.mrb[13].mxu0 }
  0xff   : > { %839 = vst.msk [vmem:[%s1367_s26 + $0x168] sm:$0xff] %vm793_vm1, %v1133_v31  ;;  %v694_v33 = vpop.f32.mrb[13].mxu1  ;;  %806 = vst.msk [vmem:[%s1367_s26 + $0x60] sm:$0xff] %vm793_vm1, %v534_v32 }
 0x100   : > { %838 = vst.msk [vmem:[%s1367_s26 + $0x160] sm:$0xff] %vm793_vm1, %v694_v33 }
 0x101   : > { %v1088_v34 = vpop.f32.mrb[14].mxu0 }
 0x102   : > { %v1136_v35 = vpop.f32.mrb[14].mxu1  ;;  %809 = vst.msk [vmem:[%s1367_s26 + $0x78] sm:$0xff] %vm793_vm1, %v1088_v34  ;;  %v544_v36 = vpop.f32.mrb[15].mxu0 }
 0x103   : > { %841 = vst.msk [vmem:[%s1367_s26 + $0x178] sm:$0xff] %vm793_vm1, %v1136_v35  ;;  %v704_v37 = vpop.f32.mrb[15].mxu1  ;;  %808 = vst.msk [vmem:[%s1367_s26 + $0x70] sm:$0xff] %vm793_vm1, %v544_v36 }
 0x104   : > { %840 = vst.msk [vmem:[%s1367_s26 + $0x170] sm:$0xff] %vm793_vm1, %v704_v37 }
 0x105   : > { %v1091_v38 = vpop.f32.mrb[16].mxu0 }
 0x106   : > { %v1139_v39 = vpop.f32.mrb[16].mxu1  ;;  %811 = vst.msk [vmem:[%s1367_s26 + $0x88] sm:$0xff] %vm793_vm1, %v1091_v38  ;;  %v554_v40 = vpop.f32.mrb[17].mxu0 }
 0x107   : > { %843 = vst.msk [vmem:[%s1367_s26 + $0x188] sm:$0xff] %vm793_vm1, %v1139_v39  ;;  %v714_v41 = vpop.f32.mrb[17].mxu1  ;;  %810 = vst.msk [vmem:[%s1367_s26 + $0x80] sm:$0xff] %vm793_vm1, %v554_v40 }
 0x108   : > { %842 = vst.msk [vmem:[%s1367_s26 + $0x180] sm:$0xff] %vm793_vm1, %v714_v41 }
 0x109   : > { %v1094_v42 = vpop.f32.mrb[18].mxu0 }
 0x10a   : > { %v1142_v43 = vpop.f32.mrb[18].mxu1  ;;  %813 = vst.msk [vmem:[%s1367_s26 + $0x98] sm:$0xff] %vm793_vm1, %v1094_v42  ;;  %v564_v44 = vpop.f32.mrb[19].mxu0 }
 0x10b   : > { %845 = vst.msk [vmem:[%s1367_s26 + $0x198] sm:$0xff] %vm793_vm1, %v1142_v43  ;;  %v724_v45 = vpop.f32.mrb[19].mxu1  ;;  %812 = vst.msk [vmem:[%s1367_s26 + $0x90] sm:$0xff] %vm793_vm1, %v564_v44 }
 0x10c   : > { %844 = vst.msk [vmem:[%s1367_s26 + $0x190] sm:$0xff] %vm793_vm1, %v724_v45 }
 0x10d   : > { %v1097_v46 = vpop.f32.mrb[20].mxu0 }
 0x10e   : > { %v1145_v47 = vpop.f32.mrb[20].mxu1  ;;  %815 = vst.msk [vmem:[%s1367_s26 + $0xa8] sm:$0xff] %vm793_vm1, %v1097_v46  ;;  %v574_v48 = vpop.f32.mrb[21].mxu0 }
 0x10f   : > { %847 = vst.msk [vmem:[%s1367_s26 + $0x1a8] sm:$0xff] %vm793_vm1, %v1145_v47  ;;  %v734_v49 = vpop.f32.mrb[21].mxu1  ;;  %814 = vst.msk [vmem:[%s1367_s26 + $0xa0] sm:$0xff] %vm793_vm1, %v574_v48 }
 0x110   : > { %846 = vst.msk [vmem:[%s1367_s26 + $0x1a0] sm:$0xff] %vm793_vm1, %v734_v49 }
 0x111   : > { %v1100_v50 = vpop.f32.mrb[22].mxu0 }
 0x112   : > { %v1148_v51 = vpop.f32.mrb[22].mxu1  ;;  %817 = vst.msk [vmem:[%s1367_s26 + $0xb8] sm:$0xff] %vm793_vm1, %v1100_v50  ;;  %v584_v52 = vpop.f32.mrb[23].mxu0 }
 0x113   : > { %849 = vst.msk [vmem:[%s1367_s26 + $0x1b8] sm:$0xff] %vm793_vm1, %v1148_v51  ;;  %v744_v53 = vpop.f32.mrb[23].mxu1  ;;  %816 = vst.msk [vmem:[%s1367_s26 + $0xb0] sm:$0xff] %vm793_vm1, %v584_v52 }
 0x114   : > { %848 = vst.msk [vmem:[%s1367_s26 + $0x1b0] sm:$0xff] %vm793_vm1, %v744_v53 }
 0x115   : > { %v1103_v54 = vpop.f32.mrb[24].mxu0 }
 0x116   : > { %v1151_v55 = vpop.f32.mrb[24].mxu1  ;;  %819 = vst.msk [vmem:[%s1367_s26 + $0xc8] sm:$0xff] %vm793_vm1, %v1103_v54  ;;  %v594_v56 = vpop.f32.mrb[25].mxu0 }
 0x117   : > { %851 = vst.msk [vmem:[%s1367_s26 + $0x1c8] sm:$0xff] %vm793_vm1, %v1151_v55  ;;  %v754_v57 = vpop.f32.mrb[25].mxu1  ;;  %818 = vst.msk [vmem:[%s1367_s26 + $0xc0] sm:$0xff] %vm793_vm1, %v594_v56 }
 0x118   : > { %850 = vst.msk [vmem:[%s1367_s26 + $0x1c0] sm:$0xff] %vm793_vm1, %v754_v57 }
 0x119   : > { %v1106_v58 = vpop.f32.mrb[26].mxu0 }
 0x11a   : > { %v1154_v59 = vpop.f32.mrb[26].mxu1  ;;  %821 = vst.msk [vmem:[%s1367_s26 + $0xd8] sm:$0xff] %vm793_vm1, %v1106_v58  ;;  %v604_v60 = vpop.f32.mrb[27].mxu0 }
 0x11b   : > { %853 = vst.msk [vmem:[%s1367_s26 + $0x1d8] sm:$0xff] %vm793_vm1, %v1154_v59  ;;  %v764_v61 = vpop.f32.mrb[27].mxu1  ;;  %820 = vst.msk [vmem:[%s1367_s26 + $0xd0] sm:$0xff] %vm793_vm1, %v604_v60 }
 0x11c   : > { %852 = vst.msk [vmem:[%s1367_s26 + $0x1d0] sm:$0xff] %vm793_vm1, %v764_v61 }
 0x11d   : > { %v1109_v62 = vpop.f32.mrb[28].mxu0 }
 0x11e   : > { %v1157_v63 = vpop.f32.mrb[28].mxu1  ;;  %823 = vst.msk [vmem:[%s1367_s26 + $0xe8] sm:$0xff] %vm793_vm1, %v1109_v62  ;;  %v614_v0 = vpop.f32.mrb[29].mxu0 }
 0x11f   : > { %855 = vst.msk [vmem:[%s1367_s26 + $0x1e8] sm:$0xff] %vm793_vm1, %v1157_v63  ;;  %v774_v1 = vpop.f32.mrb[29].mxu1  ;;  %822 = vst.msk [vmem:[%s1367_s26 + $0xe0] sm:$0xff] %vm793_vm1, %v614_v0 }
 0x120   : > { %854 = vst.msk [vmem:[%s1367_s26 + $0x1e0] sm:$0xff] %vm793_vm1, %v774_v1 }
 0x121   : > { %v1112_v2 = vpop.f32.mrb[30].mxu0 }
 0x122   : > { %v1160_v3 = vpop.f32.mrb[30].mxu1  ;;  %825 = vst.msk [vmem:[%s1367_s26 + $0xf8] sm:$0xff] %vm793_vm1, %v1112_v2  ;;  %v624_v4 = vpop.f32.mrb[31].mxu0 }
 0x123   : > { %857 = vst.msk [vmem:[%s1367_s26 + $0x1f8] sm:$0xff] %vm793_vm1, %v1160_v3  ;;  %v784_v5 = vpop.f32.mrb[31].mxu1  ;;  %824 = vst.msk [vmem:[%s1367_s26 + $0xf0] sm:$0xff] %vm793_vm1, %v624_v4 }
 0x124   : > { %856 = vst.msk [vmem:[%s1367_s26 + $0x1f0] sm:$0xff] %vm793_vm1, %v784_v5 }
 0x125 PF: > { %s12_s9 = sadd.s32 1, %s1187_s9  }
 0x126   : > { %p9_p4 = scmp.ge.s32.totalorder %s12_s9, 4  }
 0x128   :  { %11 = sbr.rel (!%p9_p4) target bundleno = 1 (0x1), region = 58 }

</bundles_post_ra>
